<compile_context>
chip_gen: v7x
topology: tpu7x:2x2x1
jax: 0.10.0
libtpu: 0.0.40
codegen_flags: <defaults>
</compile_context>

<pallas_src>
import functools

import jax
import jax.numpy as jnp
from jax import lax
from jax.experimental import pallas as pl
from jax.experimental.pallas import tpu as pltpu


def _label_smoothing_kernel(x_ref, t_ref, out_ref, *,
                            conf_over_n, smooth_over_cn, inv_n):
    i = pl.program_id(1)

    @pl.when(i == 0)
    def _():
        out_ref[...] = jnp.zeros_like(out_ref)

    x = x_ref[...].astype(jnp.float32)                     # (tm, C)
    tm, c = x.shape

    # Shifted logits; the row max cancels exactly in the smoothed loss since
    # confidence + smoothing == 1, so only y is needed downstream (x dies here).
    m = jnp.max(x, axis=-1, keepdims=True)                 # (tm, 1)
    y = x - m                                               # (tm, C)

    # Row log-sum-exp of the shifted logits.
    sumexp = jnp.sum(jnp.exp(y), axis=-1, keepdims=True)   # (tm, 1)

    # Fused weighted reduce replacing separate x[target] gather + row sum:
    # target column weight = conf/N + sm/(C*N); all others sm/(C*N).
    tgt = t_ref[...]                                        # (tm, 1) int32
    iota = lax.broadcasted_iota(jnp.int32, (tm, c), 1)
    w = jnp.where(iota == tgt, conf_over_n + smooth_over_cn, smooth_over_cn)

    step = inv_n * jnp.sum(jnp.log(sumexp)) - jnp.sum(y * w)   # scalar (0-d)

    # Single-vreg accumulate into the resident output block.
    out_ref[...] += step


@functools.lru_cache(maxsize=1)
def _chip_params():
    """Return (vmem_capacity_bytes, has_two_tensorcores)."""
    kind = ""
    try:
        kind = jax.devices()[0].device_kind.lower()
    except Exception:
        pass
    is_v7 = ("v7" in kind) or ("7x" in kind) or ("tpu7" in kind)
    # Megacore (v4/v5p) also shards "parallel" grid axes across two cores.
    two_tc = is_v7 or ("v4" in kind) or ("v5p" in kind)
    vmem_cap = None
    try:
        info = pltpu.get_tpu_info()
        vmem_cap = int(getattr(info, "vmem_capacity_bytes", 0)) or None
    except Exception:
        vmem_cap = None
    if vmem_cap is None:
        vmem_cap = (64 << 20) if is_v7 else (128 << 20)
    return vmem_cap, two_tc


def _budgets(vmem_cap):
    """Generation-aware (double-buffered tile budget, vmem_limit ceiling)."""
    if vmem_cap <= (64 << 20):        # v7x-class: 64 MiB per TensorCore
        return 22 << 20, 52 << 20     # ~20-24 MiB of tiles, ceiling well < 64
    return 28 << 20, 96 << 20         # v5e/v6e: 128 MiB physical


def _choose_tiling(n, c, itemsize, tm_req, tile_budget, two_tc):
    """Pick (splits, tm, sublane_step)."""
    sub = {4: 8, 2: 16, 1: 32}.get(itemsize, 8)     # dtype-aware sublane packing
    splits = 2 if (two_tc and n >= 2 * sub and n % (2 * sub) == 0) else 1
    per = n // splits
    if per % sub != 0:
        # Single full-batch block (block dim == full array dim is legal).
        return 1, n, sub
    # True padded per-row footprint of one pipeline buffer:
    #   x row: c*itemsize bytes; the (tm,1) int32 target row pads to 128 lanes.
    row_bytes = c * itemsize + 128 * 4
    cap = max(sub, (tile_budget // (2 * row_bytes)) // sub * sub)
    if tm_req is None:
        tm_req = cap
    tm_req = min(tm_req, cap, per)
    tm = sub
    for cand in range((tm_req // sub) * sub, sub - 1, -sub):
        if per % cand == 0:
            tm = cand
            break
    return splits, tm, sub


def label_smoothing_loss(x, target, smoothing=0.0, *, tm=None):
    """x: (N, C) float logits, target: (N,) int labels -> scalar mean loss."""
    n, c = x.shape
    itemsize = jnp.dtype(x.dtype).itemsize
    vmem_cap, two_tc = _chip_params()
    tile_budget, vmem_ceiling = _budgets(vmem_cap)
    splits, tm, _ = _choose_tiling(n, c, itemsize, tm, tile_budget, two_tc)
    inner = n // (splits * tm)

    # Fold all constants at trace time (plain Python floats -> nothing captured).
    confidence = 1.0 - float(smoothing)
    conf_over_n = float(confidence / n)
    smooth_over_cn = float(smoothing / (c * n))
    inv_n = float(1.0 / n)

    t2d = target.astype(jnp.int32).reshape(n, 1)

    kernel = functools.partial(
        _label_smoothing_kernel,
        conf_over_n=conf_over_n,
        smooth_over_cn=smooth_over_cn,
        inv_n=inv_n,
    )

    out_shape = jax.ShapeDtypeStruct((splits, 8, 128), jnp.float32)

    # VMEM need with the padded footprint of the (tm,1) target blocks included.
    vmem_need = (2 * tm * c * itemsize        # double-buffered x tiles
                 + 2 * tm * 128 * 4           # double-buffered padded target tiles
                 + 2 * 8 * 128 * 4            # output block (double-buffered)
                 + (2 << 20))                 # compiler headroom
    vmem_limit = int(min(max(vmem_need, 16 << 20), vmem_ceiling))

    cost = pl.CostEstimate(
        flops=5 * n * c,
        transcendentals=n * c + n,
        bytes_accessed=n * c * itemsize + n * 4 + splits * 8 * 128 * 4,
    )

    out = pl.pallas_call(
        kernel,
        out_shape=out_shape,
        grid_spec=pltpu.PrefetchScalarGridSpec(
            num_scalar_prefetch=0,
            grid=(splits, inner),
            in_specs=[
                pl.BlockSpec((tm, c), lambda s, i: (s * inner + i, 0)),
                pl.BlockSpec((tm, 1), lambda s, i: (s * inner + i, 0)),
            ],
            out_specs=pl.BlockSpec((1, 8, 128), lambda s, i: (s, 0, 0)),
        ),
        compiler_params=pltpu.CompilerParams(
            dimension_semantics=("parallel", "arbitrary"),
            vmem_limit_bytes=vmem_limit,
        ),
        cost_estimate=cost,
    )(x, t2d)

    # Per-split partials are already divided by N; just add them up.
    return jnp.sum(out[:, 0, 0])


def _reference(x, target, smoothing):
    confidence = 1.0 - smoothing
    logprobs = jax.nn.log_softmax(x.astype(jnp.float32), axis=-1)
    nll = -jnp.take_along_axis(logprobs, target[:, None], axis=-1)[:, 0]
    smooth = -jnp.mean(logprobs, axis=-1)
    return jnp.mean(confidence * nll + smoothing * smooth)


if __name__ == "__main__":
    key = jax.random.PRNGKey(0)
    kx, kt = jax.random.split(key)
    N, C = 16, 128
    smoothing = 0.1

    x = jax.random.normal(kx, (N, C), dtype=jnp.float32)
    target = jax.random.randint(kt, (N,), 0, C, dtype=jnp.int32)

    loss = label_smoothing_loss(x, target, smoothing=smoothing)
    loss = jax.block_until_ready(loss)

    ref = _reference(x, target, smoothing)
    assert jnp.allclose(loss, ref, atol=1e-4, rtol=1e-4), (loss, ref)
    print("KERNEL_OK")
</pallas_src>

<mosaic_0001>
module attributes {stable_mosaic.version = 11 : i64} {
  func.func @_label_smoothing_kernel(%arg0: i32, %arg1: i32, %arg2: memref<16x128xf32, #tpu.memory_space<vmem>>, %arg3: memref<16x1xi32, #tpu.memory_space<vmem>>, %arg4: memref<1x8x128xf32, #tpu.memory_space<vmem>>) attributes {dimension_semantics = [#tpu.dimension_semantics<parallel>, #tpu.dimension_semantics<arbitrary>], iteration_bounds = array<i64: 1, 1>, scalar_prefetch = 0 : i64, scratch_operands = 0 : i64, tpu.core_type = #tpu.core_type<tc>, window_params = [{transform_indices = @transform_0, window_bounds = array<i64: 16, 128>}, {transform_indices = @transform_1, window_bounds = array<i64: 16, 1>}, {transform_indices = @transform_2, window_bounds = array<i64: 1, 8, 128>}]} {
    %c0_i32 = arith.constant 0 : i32
    %0 = arith.cmpi eq, %arg1, %c0_i32 : i32
    %1 = arith.extui %0 : i1 to i32
    %c0_i32_0 = arith.constant 0 : i32
    %2 = arith.cmpi ne, %1, %c0_i32_0 : i32
    scf.if %2 {
      %cst_16 = arith.constant 0.000000e+00 : f32
      %34 = vector.broadcast %cst_16 : f32 to vector<1x8x128xf32>
      %c0_17 = arith.constant 0 : index
      %c0_18 = arith.constant 0 : index
      %c0_19 = arith.constant 0 : index
      %35 = vector.load %arg4[%c0_17, %c0_18, %c0_19] : memref<1x8x128xf32, #tpu.memory_space<vmem>>, vector<1x8x128xf32>
      tpu.vector_store %arg4[%c0_17, %c0_18, %c0_19], %34 {strides = array<i32>} : memref<1x8x128xf32, #tpu.memory_space<vmem>>, vector<1x8x128xf32>,
    } else {
    }
    %c0 = arith.constant 0 : index
    %c0_1 = arith.constant 0 : index
    %3 = vector.load %arg2[%c0, %c0_1] : memref<16x128xf32, #tpu.memory_space<vmem>>, vector<16x128xf32>
    %cst = arith.constant dense<0xFF800000> : vector<16xf32>
    %4 = vector.multi_reduction <maximumf>, %3, %cst [1] : vector<16x128xf32> to vector<16xf32>
    %5 = vector.shape_cast %4 : vector<16xf32> to vector<16x1xf32>
    %6 = vector.broadcast %5 : vector<16x1xf32> to vector<16x128xf32>
    %7 = arith.subf %3, %6 : vector<16x128xf32>
    %8 = math.exp %7 : vector<16x128xf32>
    %cst_2 = arith.constant dense<0.000000e+00> : vector<16xf32>
    %9 = vector.multi_reduction <add>, %8, %cst_2 [1] : vector<16x128xf32> to vector<16xf32>
    %10 = vector.shape_cast %9 : vector<16xf32> to vector<16x1xf32>
    %c0_3 = arith.constant 0 : index
    %c0_4 = arith.constant 0 : index
    %11 = vector.load %arg3[%c0_3, %c0_4] : memref<16x1xi32, #tpu.memory_space<vmem>>, vector<16x1xi32>
    %12 = tpu.iota {dimensions = array<i32: 1>} : vector<16x128xi32>
    %13 = vector.broadcast %11 : vector<16x1xi32> to vector<16x128xi32>
    %14 = arith.cmpi eq, %12, %13 : vector<16x128xi32>
    %cst_5 = arith.constant 0.0562988296 : f32
    %cst_6 = arith.constant 4.88281257E-5 : f32
    %15 = vector.broadcast %cst_5 : f32 to vector<16x128xf32>
    %16 = vector.broadcast %cst_6 : f32 to vector<16x128xf32>
    %17 = arith.select %14, %15, %16 : vector<16x128xi1>, vector<16x128xf32>
    %18 = math.log %10 : vector<16x1xf32>
    %19 = vector.shape_cast %18 : vector<16x1xf32> to vector<1x16x1xf32>
    %cst_7 = arith.constant dense<0.000000e+00> : vector<1xf32>
    %20 = vector.multi_reduction <add>, %19, %cst_7 [1, 2] : vector<1x16x1xf32> to vector<1xf32>
    %21 = vector.shape_cast %20 : vector<1xf32> to vector<1x1x1xf32>
    %22 = vector.extract %21[0, 0, 0] : f32 from vector<1x1x1xf32>
    %cst_8 = arith.constant 6.250000e-02 : f32
    %23 = arith.mulf %cst_8, %22 : f32
    %24 = arith.mulf %7, %17 : vector<16x128xf32>
    %25 = vector.shape_cast %24 : vector<16x128xf32> to vector<1x16x128xf32>
    %cst_9 = arith.constant dense<0.000000e+00> : vector<1xf32>
    %26 = vector.multi_reduction <add>, %25, %cst_9 [1, 2] : vector<1x16x128xf32> to vector<1xf32>
    %27 = vector.shape_cast %26 : vector<1xf32> to vector<1x1x1xf32>
    %28 = vector.extract %27[0, 0, 0] : f32 from vector<1x1x1xf32>
    %29 = arith.subf %23, %28 : f32
    %c0_10 = arith.constant 0 : index
    %c0_11 = arith.constant 0 : index
    %c0_12 = arith.constant 0 : index
    %30 = vector.load %arg4[%c0_10, %c0_11, %c0_12] : memref<1x8x128xf32, #tpu.memory_space<vmem>>, vector<1x8x128xf32>
    %31 = vector.broadcast %29 : f32 to vector<1x8x128xf32>
    %32 = arith.addf %30, %31 : vector<1x8x128xf32>
    %c0_13 = arith.constant 0 : index
    %c0_14 = arith.constant 0 : index
    %c0_15 = arith.constant 0 : index
    %33 = vector.load %arg4[%c0_13, %c0_14, %c0_15] : memref<1x8x128xf32, #tpu.memory_space<vmem>>, vector<1x8x128xf32>
    tpu.vector_store %arg4[%c0_13, %c0_14, %c0_15], %32 {strides = array<i32>} : memref<1x8x128xf32, #tpu.memory_space<vmem>>, vector<1x8x128xf32>,
    return
  }
  func.func @transform_0(%arg0: i32, %arg1: i32) -> (i32, i32) {
    %c1_i32 = arith.constant 1 : i32
    %0 = arith.muli %arg0, %c1_i32 : i32
    %1 = arith.addi %0, %arg1 : i32
    %c0_i32 = arith.constant 0 : i32
    %c0_i32_0 = arith.constant 0 : i32
    return %1, %c0_i32 : i32, i32
  }
  func.func @transform_1(%arg0: i32, %arg1: i32) -> (i32, i32) {
    %c1_i32 = arith.constant 1 : i32
    %0 = arith.muli %arg0, %c1_i32 : i32
    %1 = arith.addi %0, %arg1 : i32
    %c0_i32 = arith.constant 0 : i32
    %c0_i32_0 = arith.constant 0 : i32
    return %1, %c0_i32 : i32, i32
  }
  func.func @transform_2(%arg0: i32, %arg1: i32) -> (i32, i32, i32) {
    %c0_i32 = arith.constant 0 : i32
    %c0_i32_0 = arith.constant 0 : i32
    %c0_i32_1 = arith.constant 0 : i32
    return %arg0, %c0_i32, %c0_i32_0 : i32, i32, i32
  }
}

</mosaic_0001>

<bundles_post_ra>
// kernel: tpu_custom_call.1
= control target key start
LH: loop header
LB: loop body
LE: loop exit
PB: predicated region body
PF: predicated region fallthrough
CT: control target
= control target key end

     0   :  { %v194_v1 = vmov 0   ;;  %s236_s0 = inlined_call_operand.vmem [shape: f32[16,128], index: 0, kind: input, shape index: {}]   ;;  %s237_s1 = inlined_call_operand.vmem [shape: s32[16,1], index: 1, kind: input, shape index: {}]   ;;  %s238_s2 = inlined_call_operand.hbm [shape: f32[1,8,128], index: 2, kind: output, shape index: {}]  }
   0x1   :  { %v61_v0 = vld [vmem:[%s236_s0] sm:$0xff]  ;;  %161 = vset.pattern.permute.xlu1 %v194_v1 }
   0x2   :  { %63 = vmax.xlane.f32.xlu0 %v61_v0 }
   0x3   :  { %7 = vsyncpa [#allocation3], 0  ;;  %v62_v2 = vld [vmem:[%s236_s0 + $0x8] sm:$0xff]  ;;  %160 = vset.pattern.permute.xlu0 %v194_v1  ;;  %v77_v3 = vld [vmem:[%s237_s1] sm:$0xff]  ;;  %v79_v13 = vlaneseq  ;;  %v195_v18 = vmov 4.8828126e-05  }
   0x4   :  { %v78_v12 = vld [vmem:[%s237_s1 + $0x8] sm:$0xff]  ;;  %vm95_vm2 = vcmask 7168   ;;  %s196_s19 = smov [#allocation2]  }
   0x5   :  { %v80_v15 = vand.u32 127, %v79_v13  ;;  %s132_s20 = sshll.u32 %s196_s19, 4  ;;  %s133_s20 = int_to_ptr.vmem [resolvable:$true] %s132_s20 }
   0x6   :  { %65 = vmax.xlane.f32.xlu0 %v62_v2  ;;  %s170_s21 = scalar_lea.vmem %s133_s20, 128  ;;  %p175_p1 = scmp.lt.s32.totalorder %s133_s20, %s133_s20 }
   0x7   :  { %p171_p0 = scmp.ne.s32.totalorder %s133_s20, %s170_s21  ;;  %p176_p2 = scmp.lt.s32.totalorder %s170_s21, %s170_s21 }
   0x9   :  { %p177_p3 = por %p176_p2, %p175_p1 }
   0xb   :  { %p178_p4 = pnand %p177_p3, %p171_p0 }
  0x1c   :  { %82 = vperm.xlu0 %160, %v77_v3  }
  0x8f   :  { %v64_v4 = vpop.xlane.xlu0 %63 }
  0x90   :  { %v67_v5 = vsub.f32 %v61_v0, %v64_v4 }
  0x92   :  { %v69_v6 = vmul.f32 1.442695, %v67_v5 }
  0x93   :  { %v66_v7 = vpop.xlane.xlu0 %65 }
  0x94   :  { %v68_v8 = vsub.f32 %v62_v2, %v66_v7  ;;  %162 = vpow2.f32 %v69_v6 }
  0x96   :  { %v71_v9 = vmul.f32 1.442695, %v68_v8 }
  0x98   :  { %164 = vpow2.f32 %v71_v9 }
  0x9b   :  { %v83_v16 = vpop.permute.xlu0 %82 }
  0x9c   :  { %vm87_vm0 = vcmp.eq.s32.totalorder %v80_v15, %v83_v16 }
  0x9d   :  { %v89_v19 = vsel %vm87_vm0, 0.05629883, %v195_v18 }
  0x9e   :  { %v163_v10 = vpop.eup %162  ;;  %v109_v23 = vmul.f32 %v89_v19, %v67_v5 }
  0x9f   :  { %73 = vadd.xlane.f32.xlu1 %v163_v10 }
  0xa2   :  { %v165_v11 = vpop.eup %164 }
  0xa3   :  { %75 = vadd.xlane.f32.xlu1 %v165_v11 }
  0xb4   :  { %85 = vperm.xlu1 %161, %v78_v12  }
 0x12c   :  { %v74_v14 = vpop.xlane.xlu1 %73 }
 0x12d   :  { %166 = vlog2.f32 %v74_v14 }
 0x130   :  { %v76_v17 = vpop.xlane.xlu1 %75 }
 0x131   :  { %168 = vlog2.f32 %v76_v17 }
 0x134   :  { %v86_v20 = vpop.permute.xlu1 %85 }
 0x135   :  { %vm88_vm1 = vcmp.eq.s32.totalorder %v80_v15, %v86_v20 }
 0x136   :  { %v90_v21 = vsel %vm88_vm1, 0.05629883, %v195_v18 }
 0x137   :  { %v167_v22 = vpop.eup %166  ;;  %v110_v24 = vmul.f32 %v90_v21, %v68_v8 }
 0x138   :  { %v92_v26 = vmul.f32 0.6931472, %v167_v22 }
 0x139   :  { %v111_v25 = vadd.f32 %v110_v24, %v109_v23 }
 0x13a   :  { %v96_v29 = vsel %vm95_vm2, %v92_v26, 0.0 }
 0x13b   :  { %v169_v27 = vpop.eup %168  ;;  %112 = vadd.xlane.f32.xlu0 %v111_v25 }
 0x13c   :  { %v94_v28 = vmul.f32 0.6931472, %v169_v27 }
 0x13e   :  { %v97_v30 = vsel %vm95_vm2, %v94_v28, 0.0 }
 0x13f   :  { %v98_v31 = vadd.f32 %v97_v30, %v96_v29 }
 0x141   :  { %99 = vadd.xlane.f32.xlu1 %v98_v31 }
 0x1c8   :  { %v113_v32 = vpop.xlane.xlu0 %112 }
 0x1c9   :  { %v114_v33 = vrot.slane %v113_v32, 4 }
 0x1cb   :  { %v115_v34 = vadd.f32 %v114_v33, %v113_v32 }
 0x1cd   :  { %v116_v35 = vrot.slane %v115_v34, 2 }
 0x1ce   :  { %v100_v36 = vpop.xlane.xlu1 %99 }
 0x1cf   :  { %v101_v37 = vrot.slane %v100_v36, 4  ;;  %v117_v39 = vadd.f32 %v116_v35, %v115_v34 }
 0x1d1   :  { %v102_v38 = vadd.f32 %v101_v37, %v100_v36  ;;  %v118_v42 = vrot.slane %v117_v39, 1 }
 0x1d3   :  { %v103_v40 = vrot.slane %v102_v38, 2  ;;  %v119_v45 = vadd.f32 %v118_v42, %v117_v39 }
 0x1d5   :  { %v104_v41 = vadd.f32 %v103_v40, %v102_v38 }
 0x1d7   :  { %v105_v43 = vrot.slane %v104_v41, 1 }
 0x1d9   :  { %v106_v44 = vadd.f32 %v105_v43, %v104_v41 }
 0x1db   :  { %152 = vpush %v106_v44 }
 0x1dc   :  { %154 = vpush %v119_v45 }
 0x20c   :  { %s153_s1 = spop %152 }
 0x20d   :  { %s108_s16 = smul.f32 0.0625, %s153_s1  ;;  %s155_s17 = spop %154 }
 0x20f   :  { %s121_s18 = ssub.f32 %s108_s16, %s155_s17 }
 0x211   :  { %v123_v46 = vstv %s121_s18 }
 0x212   :  { %125 = vst [vmem:[#allocation2] sm:$0xff] %v123_v46 }
 0x213   :  { %181 = shalt.err (!%p178_p4)
}
 0x214   :  { %s182_s24 = scalar_lea.hbm %s238_s2, 128 }
 0x215   :  { %p183_p5 = scmp.ne.s32.totalorder %s238_s2, %s182_s24  ;;  %p186_p6 = scmp.lt.u32.totalorder %s182_s24, %s238_s2 }
 0x217   :  { %p188_p7 = pnand %p186_p6, %p183_p5 }
 0x219   :  { %191 = shalt.err (!%p188_p7)
}
 0x21a   :  { %135 = dma.vmem_to_hbm [thread:$0]  %s133_s20, 128, %s238_s2, [#allocation3]  }
 0x21b   :  { %192 = dma.done.wait [#allocation3], 128  }
 0x21c   :  { %193 = vsyncadd [#allocation3], 4294967168 }
 0x21d   :  { %139 = vsyncpa [#allocation3], 1 }

</bundles_post_ra>
